<compile_context>
chip_gen: v7x
topology: tpu7x:2x2x1
jax: 0.10.0
libtpu: 0.0.40
codegen_flags: <defaults>
</compile_context>

<pallas_src>
import functools

import jax
import jax.numpy as jnp
from jax.experimental import pallas as pl
from jax.experimental.pallas import tpu as pltpu

_LANE = 128       # vreg lane width
_SUBLANE = 8      # vreg sublane width
_NEG_PAD = -1e30  # bias for padded class columns; exp() underflows to exactly 0


def _round_up(x, m):
    return (x + m - 1) // m * m


# ----------------------------- Pallas kernel ------------------------------ #

def _categorical_head_kernel(x_ref, w_ref, b_ref, out_ref):
    # x_ref: (TM, K)  w_ref: (K, Np)  b_ref: (1, Np)  out_ref: (TM, Np)
    x = x_ref[...]
    w = w_ref[...]
    # Cast the activation tile to the weight dtype (bf16 by default) in-register so
    # the MXU runs its native low-precision path with f32 accumulation; the cast is a
    # VPU op on data already in vregs, so it adds zero HBM traffic.
    logits = jnp.dot(x.astype(w.dtype), w,
                     preferred_element_type=jnp.float32) + b_ref[...]
    # Numerically-stable log-softmax along the (lane) class axis.  Padded columns carry
    # a -1e30 bias: they never win the max and exp() -> 0, so they contribute nothing
    # to the normalizer.
    m = jnp.max(logits, axis=-1, keepdims=True)
    e = jnp.exp(logits - m)
    lse = m + jnp.log(jnp.sum(e, axis=-1, keepdims=True))
    out_ref[...] = (logits - lse).astype(out_ref.dtype)


@functools.partial(jax.jit, static_argnames=("block_m", "out_dtype"))
def categorical_head(x, w_t_pad, b_pad, *, block_m=2048, out_dtype=jnp.float32):
    """Fused Linear + log-softmax.

    x:        [M, K]   f32 (or bf16) activations
    w_t_pad:  [K, Np]  W^T, class axis zero-padded to a multiple of 128 (bf16 or f32)
    b_pad:    [1, Np]  f32 bias; padded classes hold a very negative value

    Returns PADDED normalized logits of shape [Mp, Np]; pad rows/columns are left for
    the caller (pad columns normalize to ~-1e30, i.e. probability exactly 0).
    """
    M, K = x.shape
    _, Np = w_t_pad.shape

    # Batch tile: multiple of the 8-row sublane, capped at block_m rows.  For large
    # batches force >= ~4 grid steps so v7x can shard the "parallel" axis across its
    # two TensorCores and the pipeline has prefetch/writeback depth.
    Mp8 = _round_up(M, _SUBLANE)
    if Mp8 > 1024:
        tm = min(block_m, _round_up(pl.cdiv(Mp8, 4), _SUBLANE))
    else:
        tm = min(block_m, Mp8)
    Mp = _round_up(M, tm)
    if Mp != M:
        x = jnp.pad(x, ((0, Mp - M), (0, 0)))

    return pl.pallas_call(
        _categorical_head_kernel,
        out_shape=jax.ShapeDtypeStruct((Mp, Np), out_dtype),
        grid_spec=pltpu.PrefetchScalarGridSpec(
            num_scalar_prefetch=0,
            grid=(Mp // tm,),
            in_specs=[
                pl.BlockSpec((tm, K), lambda i: (i, 0)),   # streamed per batch tile
                pl.BlockSpec((K, Np), lambda i: (0, 0)),   # VMEM-resident weight
                pl.BlockSpec((1, Np), lambda i: (0, 0)),   # VMEM-resident bias
            ],
            out_specs=pl.BlockSpec((tm, Np), lambda i: (i, 0)),
        ),
        compiler_params=pltpu.CompilerParams(
            dimension_semantics=("parallel",),        # batch tiles independent -> 2 TCs on v7x
            vmem_limit_bytes=32 * 1024 * 1024,        # explicit budget, safe on v7x's 64 MiB VMEM
        ),
    )(x, w_t_pad, b_pad)


# ------------------------ FixedCategorical (glue) ------------------------- #

class FixedCategoricalJax:
    """Mirrors FixedCategorical semantics on top of the kernel's padded normalized logits.

    Pad class columns are ~-1e30 after normalization (probability exactly 0), so
    sample / mode / log_prob consume the padded array directly; only pad batch rows
    are dropped.  `.logits` / `.probs` slice lazily when read.
    """

    def __init__(self, padded_norm_logits, batch, num_outputs):
        self._padded = padded_norm_logits   # [Mp, Np], already log-softmax normalized
        self._batch = batch
        self._num_outputs = num_outputs

    @property
    def logits(self):
        return self._padded[:self._batch, :self._num_outputs]

    @property
    def probs(self):
        # probs is a pure function of the normalized logits; computed lazily.
        return jnp.exp(self.logits)

    def sample(self, key):
        # torch: super().sample().unsqueeze(-1) -> shape [batch, 1]
        idx = jax.random.categorical(key, self._padded[:self._batch], axis=-1)
        return idx[..., None]

    def log_prob_deterministic(self, value):
        value = value.astype(jnp.int32)
        rows = self._padded[:self._batch]
        return jnp.take_along_axis(rows, value[..., None], axis=-1)[..., 0]

    def log_probs(self, value):
        return self.log_prob_deterministic(value[..., 0])[..., None]

    def mode(self):
        # argmax(probs) == argmax(logits); pad columns (~-1e30) never win.
        return jnp.argmax(self._padded[:self._batch], axis=1, keepdims=True)


# --------------------------- Categorical module ---------------------------- #

def orthogonal_init(key, out_features, in_features, gain=0.01):
    """Deterministic orthogonal init (matches nn.init.orthogonal_ semantics)."""
    rows, cols = out_features, in_features
    flat = jax.random.normal(key, (max(rows, cols), min(rows, cols)), jnp.float32)
    q, r = jnp.linalg.qr(flat)
    q = q * jnp.sign(jnp.diag(r))
    if rows < cols:
        q = q.T
    return gain * q[:rows, :cols]


class CategoricalJax:
    def __init__(self, num_inputs, num_outputs, key, param_dtype=jnp.bfloat16):
        self.num_outputs = num_outputs
        # f32 master copies (match nn.Linear); kernel-ready params cached below.
        self.weight = orthogonal_init(key, num_outputs, num_inputs, gain=0.01)  # [out, in]
        self.bias = jnp.zeros((num_outputs,), jnp.float32)

        # Precompute the kernel-ready (transposed + lane-padded) parameters ONCE.
        # Weight stored in `param_dtype` (bf16 by default -> MXU native, half the DMA);
        # bias stays f32 (tiny, and keeps the -1e30 pad sentinel exact).
        n_pad = _round_up(num_outputs, _LANE)
        self._w_t_pad = (
            jnp.zeros((num_inputs, n_pad), param_dtype)
            .at[:, :num_outputs].set(self.weight.T.astype(param_dtype))
        )
        self._b_pad = (
            jnp.full((1, n_pad), _NEG_PAD, jnp.float32)
            .at[0, :num_outputs].set(self.bias)
        )

    def __call__(self, x, block_m=2048, out_dtype=jnp.float32):
        padded = categorical_head(x, self._w_t_pad, self._b_pad,
                                  block_m=block_m, out_dtype=out_dtype)
        return FixedCategoricalJax(padded, x.shape[0], self.num_outputs)


# --------------------------------- main ------------------------------------ #

if __name__ == "__main__":
    key = jax.random.PRNGKey(0)
    k_w, k_x, k_s, k_x2 = jax.random.split(key, 4)

    batch, num_inputs, num_outputs = 8, 32, 16
    x = jax.random.normal(k_x, (batch, num_inputs), jnp.float32)

    # ---- exact f32 path: parity vs pure-JAX reference at 1e-5 ----
    head_f32 = CategoricalJax(num_inputs, num_outputs, k_w, param_dtype=jnp.float32)
    dist = head_f32(x)

    mode = dist.mode()                       # [batch, 1]
    sample = dist.sample(k_s)                # [batch, 1]
    lp = dist.log_probs(sample)              # [batch, 1]
    probs = dist.probs                       # [batch, num_outputs]
    jax.block_until_ready((dist.logits, probs, mode, sample, lp))

    ref_logits = x @ head_f32.weight.T + head_f32.bias
    ref_norm = ref_logits - jax.nn.logsumexp(ref_logits, axis=-1, keepdims=True)
    ref_probs = jax.nn.softmax(ref_logits, axis=-1)
    assert dist.logits.shape == (batch, num_outputs)
    assert jnp.allclose(dist.logits, ref_norm, atol=1e-5)
    assert jnp.allclose(probs, ref_probs, atol=1e-5)
    assert mode.shape == (batch, 1) and sample.shape == (batch, 1) and lp.shape == (batch, 1)
    assert jnp.all(mode[:, 0] == jnp.argmax(ref_logits, axis=-1))

    # ---- default bf16-weight path (perf config): looser tolerance ----
    head_bf16 = CategoricalJax(num_inputs, num_outputs, k_w)   # param_dtype=bf16
    dist_b = head_bf16(x)
    jax.block_until_ready(dist_b.logits)
    assert dist_b.logits.shape == (batch, num_outputs)
    assert jnp.allclose(dist_b.logits, ref_norm, atol=2e-2)
    s_b = dist_b.sample(k_s)
    lp_b = dist_b.log_probs(s_b)
    m_b = dist_b.mode()
    jax.block_until_ready((s_b, lp_b, m_b))
    assert s_b.shape == (batch, 1) and lp_b.shape == (batch, 1) and m_b.shape == (batch, 1)

    # ---- large batch: exercises the multi-step grid (>= 4 tiles) + padded rows ----
    batch2 = 1500
    x2 = jax.random.normal(k_x2, (batch2, num_inputs), jnp.float32)
    dist2 = head_f32(x2)                     # Mp8=1504 -> tm=376, grid=(4,), 4 pad rows
    jax.block_until_ready(dist2.logits)
    ref2 = x2 @ head_f32.weight.T + head_f32.bias
    ref2_norm = ref2 - jax.nn.logsumexp(ref2, axis=-1, keepdims=True)
    assert dist2.logits.shape == (batch2, num_outputs)
    assert jnp.allclose(dist2.logits, ref2_norm, atol=1e-5)
    assert jnp.all(dist2.mode()[:, 0] == jnp.argmax(ref2, axis=-1))

    print("KERNEL_OK")
</pallas_src>

<mosaic_0001>
module attributes {stable_mosaic.version = 11 : i64} {
  func.func @_categorical_head_kernel(%arg0: i32, %arg1: memref<8x32xf32, #tpu.memory_space<vmem>>, %arg2: memref<32x128xf32, #tpu.memory_space<vmem>>, %arg3: memref<1x128xf32, #tpu.memory_space<vmem>>, %arg4: memref<8x128xf32, #tpu.memory_space<vmem>>) attributes {dimension_semantics = [#tpu.dimension_semantics<parallel>], iteration_bounds = array<i64: 1>, scalar_prefetch = 0 : i64, scratch_operands = 0 : i64, tpu.core_type = #tpu.core_type<tc>, window_params = [{transform_indices = @transform_0, window_bounds = array<i64: 8, 32>}, {pipeline_mode = #tpu.pipeline_mode<synchronous>, transform_indices = @transform_1, window_bounds = array<i64: 32, 128>}, {pipeline_mode = #tpu.pipeline_mode<synchronous>, transform_indices = @transform_2, window_bounds = array<i64: 1, 128>}, {transform_indices = @transform_3, window_bounds = array<i64: 8, 128>}]} {
    %c0 = arith.constant 0 : index
    %c0_0 = arith.constant 0 : index
    %0 = vector.load %arg1[%c0, %c0_0] : memref<8x32xf32, #tpu.memory_space<vmem>>, vector<8x32xf32>
    %c0_1 = arith.constant 0 : index
    %c0_2 = arith.constant 0 : index
    %1 = vector.load %arg2[%c0_1, %c0_2] : memref<32x128xf32, #tpu.memory_space<vmem>>, vector<32x128xf32>
    %cst = arith.constant dense<0.000000e+00> : vector<8x128xf32>
    %2 = tpu.matmul %0, %1, %cst {dimension_numbers = #tpu.dot_dimension_numbers<[1], [0], [0], [1], [0, 0, 1, 1], [], []>} : vector<8x32xf32>, vector<32x128xf32>, vector<8x128xf32> -> vector<8x128xf32>
    %c0_3 = arith.constant 0 : index
    %c0_4 = arith.constant 0 : index
    %3 = vector.load %arg3[%c0_3, %c0_4] : memref<1x128xf32, #tpu.memory_space<vmem>>, vector<1x128xf32>
    %4 = vector.broadcast %3 : vector<1x128xf32> to vector<8x128xf32>
    %5 = arith.addf %2, %4 : vector<8x128xf32>
    %cst_5 = arith.constant dense<0xFF800000> : vector<8xf32>
    %6 = vector.multi_reduction <maximumf>, %5, %cst_5 [1] : vector<8x128xf32> to vector<8xf32>
    %7 = vector.shape_cast %6 : vector<8xf32> to vector<8x1xf32>
    %8 = vector.broadcast %7 : vector<8x1xf32> to vector<8x128xf32>
    %9 = arith.subf %5, %8 : vector<8x128xf32>
    %10 = math.exp %9 : vector<8x128xf32>
    %cst_6 = arith.constant dense<0.000000e+00> : vector<8xf32>
    %11 = vector.multi_reduction <add>, %10, %cst_6 [1] : vector<8x128xf32> to vector<8xf32>
    %12 = vector.shape_cast %11 : vector<8xf32> to vector<8x1xf32>
    %13 = math.log %12 : vector<8x1xf32>
    %14 = arith.addf %7, %13 : vector<8x1xf32>
    %15 = vector.broadcast %14 : vector<8x1xf32> to vector<8x128xf32>
    %16 = arith.subf %5, %15 : vector<8x128xf32>
    %c0_7 = arith.constant 0 : index
    %c0_8 = arith.constant 0 : index
    %17 = vector.load %arg4[%c0_7, %c0_8] : memref<8x128xf32, #tpu.memory_space<vmem>>, vector<8x128xf32>
    tpu.vector_store %arg4[%c0_7, %c0_8], %16 {strides = array<i32>} : memref<8x128xf32, #tpu.memory_space<vmem>>, vector<8x128xf32>,
    return
  }
  func.func @transform_0(%arg0: i32) -> (i32, i32) {
    %c0_i32 = arith.constant 0 : i32
    %c0_i32_0 = arith.constant 0 : i32
    return %arg0, %c0_i32 : i32, i32
  }
  func.func @transform_1(%arg0: i32) -> (i32, i32) {
    %c0_i32 = arith.constant 0 : i32
    %c0_i32_0 = arith.constant 0 : i32
    %c0_i32_1 = arith.constant 0 : i32
    return %c0_i32, %c0_i32_0 : i32, i32
  }
  func.func @transform_2(%arg0: i32) -> (i32, i32) {
    %c0_i32 = arith.constant 0 : i32
    %c0_i32_0 = arith.constant 0 : i32
    %c0_i32_1 = arith.constant 0 : i32
    return %c0_i32, %c0_i32_0 : i32, i32
  }
  func.func @transform_3(%arg0: i32) -> (i32, i32) {
    %c0_i32 = arith.constant 0 : i32
    %c0_i32_0 = arith.constant 0 : i32
    return %arg0, %c0_i32 : i32, i32
  }
}

</mosaic_0001>

<bundles_post_ra>
// kernel: categorical_head.1
= control target key start
LH: loop header
LB: loop body
LE: loop exit
PB: predicated region body
PF: predicated region fallthrough
CT: control target
= control target key end

     0   :  { %8 = vsyncpa [#allocation3], 0  ;;  %s337_s0 = inlined_call_operand.hbm [shape: f32[8,32], index: 0, kind: input, shape index: {}]   ;;  %s338_s1 = inlined_call_operand.hbm [shape: f32[32,128], index: 1, kind: input, shape index: {}]   ;;  %s339_s2 = inlined_call_operand.vmem [shape: f32[1,128], index: 2, kind: input, shape index: {}]   ;;  %s340_s3 = inlined_call_operand.hbm [shape: f32[8,128], index: 3, kind: output, shape index: {}]  }
   0x1   :  { %9 = vsyncpa [#allocation6], 0 }
   0x2   :  { %10 = vsyncpa [#allocation4], 0  ;;  %s263_s12 = smov [#allocation2]   ;;  %s264_s14 = smov [#allocation5]  }
   0x3   :  { %s17_s13 = sshll.u32 %s263_s12, 4  ;;  %s26_s15 = sshll.u32 %s264_s14, 4  ;;  %s18_s13 = int_to_ptr.vmem [resolvable:$true] %s17_s13  ;;  %s291_s15 = int_to_ptr.vmem [resolvable:$true] %s26_s15 }
   0x4   :  { %s191_s18 = scalar_lea.hbm %s337_s0, 128 }
   0x5   :  { %p192_p0 = scmp.ne.s32.totalorder %s337_s0, %s191_s18  ;;  %p195_p1 = scmp.lt.u32.totalorder %s191_s18, %s337_s0 }
   0x7   :  { %p197_p2 = pnand %p195_p1, %p192_p0 }
   0x9   :  { %200 = shalt.err (!%p197_p2)
}
   0xa   :  { %s201_s23 = scalar_lea.vmem %s18_s13, 128  ;;  %p206_p4 = scmp.lt.s32.totalorder %s18_s13, %s18_s13 }
   0xb   :  { %p202_p3 = scmp.ne.s32.totalorder %s18_s13, %s201_s23  ;;  %p207_p5 = scmp.lt.s32.totalorder %s201_s23, %s201_s23 }
   0xd   :  { %p208_p6 = por %p207_p5, %p206_p4 }
   0xf   :  { %p209_p7 = pnand %p208_p6, %p202_p3 }
  0x11   :  { %212 = shalt.err (!%p209_p7)
}
  0x12   :  { %20 = dma.hbm_to_vmem [thread:$0]  %s337_s0, 128, %s18_s13, [#allocation3]  }
  0x13   :  { %s213_s28 = scalar_lea.hbm %s338_s1, 512 }
  0x14   :  { %p214_p8 = scmp.ne.s32.totalorder %s338_s1, %s213_s28  ;;  %p217_p9 = scmp.lt.u32.totalorder %s213_s28, %s338_s1 }
  0x16   :  { %p219_p10 = pnand %p217_p9, %p214_p8 }
  0x18   :  { %222 = shalt.err (!%p219_p10)
}
  0x19   :  { %s223_s6 = scalar_lea.vmem %s291_s15, 512  ;;  %p228_p12 = scmp.lt.s32.totalorder %s291_s15, %s291_s15 }
  0x1a   :  { %p224_p11 = scmp.ne.s32.totalorder %s291_s15, %s223_s6  ;;  %p229_p13 = scmp.lt.s32.totalorder %s223_s6, %s223_s6 }
  0x1c   :  { %p230_p0 = por %p229_p13, %p228_p12 }
  0x1e   :  { %p231_p1 = pnand %p230_p0, %p224_p11 }
  0x20   :  { %234 = shalt.err (!%p231_p1)
}
  0x21   :  { %s265_s0 = smov 128   ;;  %s266_s7 = smov 8  }
  0x22   :  { %32 = dma.hbm_to_vmem [thread:$0]  %s338_s1, 512, %s291_s15, [#allocation6], %s265_s0, %s265_s0, %s266_s7  }
  0x23   :  { %257 = dma.done.wait [#allocation3], 128  }
  0x24   :  { %258 = vsyncadd [#allocation3], 4294967168 }
  0x25   :  { %259 = dma.done.wait [#allocation6], 512  }
  0x26   :  { %260 = vsyncadd [#allocation6], 4294966784  ;;  %v267_v0 = vmov 0.0|0.0   ;;  %vm268_vm0 = vmmov 0   ;;  %v269_v1 = vmov 0.0   ;;  %v42_v2 = vld [vmem:[#allocation5] sm:$0xff] }
  0x27   :  { %173 = vmatprep.subr.bf16.mxu0 %v267_v0  ;;  %170 = vmatprep.mubr.msk.f32.mxu0 %vm268_vm0, %v269_v1  ;;  %v43_v3 = vld [vmem:[#allocation5 + $0x8] sm:$0xff]  ;;  %v44_v4 = vld [vmem:[#allocation5 + $0x10] sm:$0xff]  ;;  %v45_v6 = vld [vmem:[#allocation5 + $0x18] sm:$0xff]  ;;  %vm53_vm1 = vcmask 261120   ;;  %s270_s11 = smov [#allocation7]  }
  0x28   :  { %v174_v5 = vpack.c.bf16 %v43_v3, %v42_v2  ;;  %v177_v7 = vpack.c.bf16 %v45_v6, %v44_v4  ;;  %v41_v8 = vld [vmem:[#allocation2] sm:$0xff]  ;;  %s145_s12 = sshll.u32 %s270_s11, 4  ;;  %s146_s12 = int_to_ptr.vmem [resolvable:$true] %s145_s12 }
  0x29   :  { %v155_v9 = vld [vmem:[%s339_s2] ss:$0 sm:$0xff]  ;;  %s235_s2 = scalar_lea.vmem %s146_s12, 128  ;;  %p240_p3 = scmp.lt.s32.totalorder %s146_s12, %s146_s12 }
  0x2a   :  { %175 = vmatpush3.bf16.msra.mxu0 %v174_v5  ;;  %p236_p2 = scmp.ne.s32.totalorder %s146_s12, %s235_s2  ;;  %p241_p4 = scmp.lt.s32.totalorder %s235_s2, %s235_s2 }
  0x2b   :  { %176 = vmatprep.subr.bf16.mxu0 %v267_v0 }
  0x2c   :  { %p242_p5 = por %p241_p4, %p240_p3 }
  0x2e   :  { %178 = vmatpush3.bf16.msra.mxu0 %v177_v7  ;;  %p243_p6 = pnand %p242_p5, %p236_p2 }
  0x31   :  { %171 = vmatmul.mubr.msk.f32.vlgmr.msra.gmra.mrb[0].mxu0 %vm53_vm1, %v41_v8 }
 0x104   :  { %v123_v10 = vpop.f32.mrb[0].mxu0 }
 0x105   :  { %v124_v11 = vadd.f32 %v155_v9, %v123_v10  ;;  %v172_v12 = vpop.f32.mrb[1].mxu0 }
 0x107   :  { %127 = vmax.xlane.f32.xlu0 %v124_v11 }
 0x194   :  { %v128_v13 = vpop.xlane.xlu0 %127 }
 0x195   :  { %v129_v14 = vsub.f32 %v124_v11, %v128_v13 }
 0x197   :  { %v130_v15 = vmul.f32 1.442695, %v129_v14 }
 0x199   :  { %187 = vpow2.f32 %v130_v15 }
 0x1a3   :  { %v188_v16 = vpop.eup %187 }
 0x1a4   :  { %132 = vadd.xlane.f32.xlu0 %v188_v16 }
 0x231   :  { %v133_v17 = vpop.xlane.xlu0 %132 }
 0x232   :  { %189 = vlog2.f32 %v133_v17 }
 0x23c   :  { %v190_v18 = vpop.eup %189 }
 0x23d   :  { %v135_v19 = vmul.f32 0.6931472, %v190_v18 }
 0x23f   :  { %v136_v20 = vadd.f32 %v135_v19, %v128_v13 }
 0x241   :  { %v137_v21 = vsub.f32 %v124_v11, %v136_v20 }
 0x243   :  { %138 = vst [vmem:[#allocation7] sm:$0xff] %v137_v21 }
 0x244   :  { %246 = shalt.err (!%p243_p6)
}
 0x245   :  { %s247_s15 = scalar_lea.hbm %s340_s3, 128 }
 0x246   :  { %p248_p7 = scmp.ne.s32.totalorder %s340_s3, %s247_s15  ;;  %p251_p8 = scmp.lt.u32.totalorder %s247_s15, %s340_s3 }
 0x248   :  { %p253_p9 = pnand %p251_p8, %p248_p7 }
 0x24a   :  { %256 = shalt.err (!%p253_p9)
}
 0x24b   :  { %148 = dma.vmem_to_hbm [thread:$0]  %s146_s12, 128, %s340_s3, [#allocation4]  }
 0x24c   :  { %261 = dma.done.wait [#allocation4], 128  }
 0x24d   :  { %262 = vsyncadd [#allocation4], 4294967168 }
 0x24e   :  { %152 = vsyncpa [#allocation3], 1 }
 0x24f   :  { %153 = vsyncpa [#allocation6], 1 }
 0x250   :  { %154 = vsyncpa [#allocation4], 1 }

</bundles_post_ra>
